<compile_context>
chip_gen: v6e
topology: v6e:2x2x1
jax: 0.10.0
libtpu: 0.0.40
codegen_flags: <defaults>
</compile_context>

<pallas_src>
import functools

import jax
import jax.numpy as jnp
from jax.experimental import pallas as pl
from jax.experimental.pallas import tpu as pltpu

_EPS = 1e-6
_LANES = 128
_SUBLANES = 8
_TARGET_BLOCK_BYTES = 4 * 1024 * 1024     # padded bytes per input block
_VMEM_LIMIT_BYTES = 32 * 1024 * 1024      # >= 2 inputs x 2 buffers x 4 MiB


def _round_up(x, m):
    return ((x + m - 1) // m) * m


def _default_num_cores():
    """2 on chips whose TensorCores are fed by a 'parallel' grid axis
    (v7x, v4/v5p megacore); 1 on single-TC chips (v5e/v6e)."""
    # TODO(synk): on v7x, verify the "parallel" axis really shards across both
    # TensorCores; if not, switch that axis to pltpu.CORE_PARALLEL.
    try:
        kind = jax.devices()[0].device_kind.lower()
    except Exception:
        return 1
    if any(tag in kind for tag in ("v7", "7x", "v4", "v5p")):
        return 2
    return 1


def _cel_kernel(p_ref, t_ref, out_ref, *, rows, block_rows, steps, needs_mask):
    c = pl.program_id(0)
    j = pl.program_id(1)

    @pl.when(j == 0)
    def _init():
        out_ref[...] = jnp.zeros_like(out_ref)

    def _accumulate(p, t):
        # Two (1, W) lane-wide partial rows: sublane-only reduce per block;
        # the single cross-lane reduce happens once in the wrapper.
        out_ref[0:1, :] += jnp.sum(p + t, axis=0, keepdims=True)
        out_ref[1:2, :] += jnp.sum(p * t, axis=0, keepdims=True)

    if not needs_mask:
        _accumulate(p_ref[...].astype(jnp.float32),
                    t_ref[...].astype(jnp.float32))
    else:
        # Logical (unclamped) first row of this grid step.  Interior blocks
        # take the unmasked fast path; only the partial last block and fully
        # over-covered (clamped) blocks pay the mask.  NOTE: this mask and the
        # clamped index_map in the wrapper must stay in sync.
        row0 = (c * steps + j) * block_rows

        @pl.when(row0 + block_rows <= rows)
        def _interior():
            _accumulate(p_ref[...].astype(jnp.float32),
                        t_ref[...].astype(jnp.float32))

        @pl.when(row0 + block_rows > rows)
        def _boundary():
            p = p_ref[...].astype(jnp.float32)
            t = t_ref[...].astype(jnp.float32)
            row_ids = row0 + jax.lax.broadcasted_iota(
                jnp.int32, (block_rows, 1), 0)
            valid = row_ids < rows
            p = jnp.where(valid, p, 0.0)
            t = jnp.where(valid, t, 0.0)
            _accumulate(p, t)


def _cel_partial_sums(p2, t2, block_rows=None, num_cores=None):
    """p2, t2: 2-D (rows, W).  Returns (sum(p)+sum(t), sum(p*t)) as f32."""
    rows, w = p2.shape
    itemsize = jnp.dtype(p2.dtype).itemsize
    w_pad = _round_up(w, _LANES)

    if block_rows is None:
        block_rows = max(_SUBLANES,
                         (_TARGET_BLOCK_BYTES // (w_pad * itemsize))
                         // _SUBLANES * _SUBLANES)
    if block_rows >= rows:
        block_rows = rows                      # single full-extent block
    else:
        block_rows = max(_SUBLANES, block_rows // _SUBLANES * _SUBLANES)

    n_blocks = pl.cdiv(rows, block_rows)
    grid_cores = max(1, min(num_cores or _default_num_cores(), n_blocks))
    steps = pl.cdiv(n_blocks, grid_cores)
    # Mask needed iff the grid's logical coverage exceeds the real row count
    # (partial last block and/or fully over-covered clamped blocks).
    needs_mask = (grid_cores * steps * block_rows) != rows

    def in_map(c, j):
        blk = c * steps + j
        # Over-covered block indices are clamped onto valid data; their
        # contribution is zeroed by the in-kernel row mask above.
        return (jnp.minimum(blk, n_blocks - 1), 0)

    kernel = functools.partial(
        _cel_kernel, rows=rows, block_rows=block_rows, steps=steps,
        needs_mask=needs_mask)

    block_bytes = block_rows * w_pad * itemsize
    vmem_limit = int(max(_VMEM_LIMIT_BYTES, 4 * block_bytes + 2 * 1024 * 1024))

    # TODO(synk): if an xprof trace shows a DMA gap at grid-step boundaries,
    # add pipeline_mode=pl.Buffered(3) to the two input BlockSpecs.
    partials = pl.pallas_call(
        kernel,
        out_shape=jax.ShapeDtypeStruct((grid_cores, 2, w), jnp.float32),
        grid_spec=pltpu.PrefetchScalarGridSpec(
            num_scalar_prefetch=0,
            grid=(grid_cores, steps),
            in_specs=[
                pl.BlockSpec((block_rows, w), in_map),
                pl.BlockSpec((block_rows, w), in_map),
            ],
            out_specs=pl.BlockSpec((None, 2, w), lambda c, j: (c, 0, 0)),
        ),
        compiler_params=pltpu.CompilerParams(
            dimension_semantics=("parallel", "arbitrary"),
            vmem_limit_bytes=vmem_limit),
    )(p2, t2)

    return jnp.sum(partials[:, 0, :]), jnp.sum(partials[:, 1, :])


def _as_2d(x):
    """Collapse to 2-D keeping the trailing dim as the lane dim.  For NCHW
    inputs this is a pure bitcast (no HBM relayout) whenever the
    second-to-last dim is a multiple of 8; otherwise XLA may insert one
    relayout copy (documented fast-path requirement)."""
    if x.ndim == 0:
        return x.reshape(1, 1)
    if x.ndim == 1:
        if x.shape[0] >= _LANES and x.shape[0] % _LANES == 0:
            return x.reshape(-1, _LANES)
        return x.reshape(1, -1)
    return x.reshape(-1, x.shape[-1])


@functools.partial(jax.jit, static_argnames=("block_rows", "num_cores"))
def cel_loss(pred, target, *, block_rows=None, num_cores=None):
    assert pred.shape == target.shape, "pred/target shape mismatch"
    if pred.size == 0:
        return jnp.float32(0.0)

    sum_s, sum_i = _cel_partial_sums(_as_2d(pred), _as_2d(target),
                                     block_rows=block_rows,
                                     num_cores=num_cores)

    numerator = sum_s - 2.0 * sum_i      # == (p - p*t).sum() + (t - p*t).sum()
    return numerator / (sum_s + jnp.float32(_EPS))


def _cel_ref(pred, target):
    pred = pred.astype(jnp.float32)
    target = target.astype(jnp.float32)
    inter = pred * target
    num = jnp.sum(pred - inter) + jnp.sum(target - inter)
    den = jnp.sum(pred) + jnp.sum(target)
    return num / (den + _EPS)


if __name__ == "__main__":
    key = jax.random.PRNGKey(0)

    # (shape, forced block_rows, forced num_cores) — None means auto.
    # The forced-small-block cases exercise the reviewer-requested paths:
    # over-coverage by more than one full block, a fully over-covered clamped
    # block, and a partial last block — with and without the 2-way core split.
    test_cases = [
        ((2, 4, 16, 16), None, None),    # single block, auto config
        ((1, 3, 96, 75), None, None),    # non-128-aligned trailing dim
        ((2, 4, 16, 16), 48, 2),         # coverage exceeds rows by > 1 block
        ((2, 4, 200, 200), 64, 2),       # one fully over-covered clamped block
        ((2, 4, 200, 200), 96, 1),       # partial last block, single core
    ]

    for shape, brows, ncores in test_cases:
        key, k1, k2 = jax.random.split(key, 3)
        # Typical CEL usage: pred = sigmoid(logits) in [0,1], target binary.
        pred = jax.nn.sigmoid(jax.random.normal(k1, shape, dtype=jnp.float32))
        target = (jax.random.uniform(k2, shape) > 0.5).astype(jnp.float32)

        out = cel_loss(pred, target, block_rows=brows, num_cores=ncores)
        out = jax.block_until_ready(out)

        ref = _cel_ref(pred, target)
        assert jnp.allclose(out, ref, rtol=1e-5, atol=1e-6), (
            shape, brows, ncores, out, ref)

    print("KERNEL_OK")
</pallas_src>

<mosaic_0001>
module attributes {stable_mosaic.version = 11 : i64} {
  func.func @_cel_kernel(%arg0: i32, %arg1: i32, %arg2: memref<128x16xf32, #tpu.memory_space<vmem>>, %arg3: memref<128x16xf32, #tpu.memory_space<vmem>>, %arg4: memref<1x2x16xf32, #tpu.memory_space<vmem>>) attributes {dimension_semantics = [#tpu.dimension_semantics<parallel>, #tpu.dimension_semantics<arbitrary>], iteration_bounds = array<i64: 1, 1>, scalar_prefetch = 0 : i64, scratch_operands = 0 : i64, tpu.core_type = #tpu.core_type<tc>, window_params = [{transform_indices = @transform_0, window_bounds = array<i64: 128, 16>}, {transform_indices = @transform_1, window_bounds = array<i64: 128, 16>}, {transform_indices = @transform_2, window_bounds = array<i64: 1, 2, 16>}]} {
    %c0_i32 = arith.constant 0 : i32
    %0 = arith.cmpi eq, %arg1, %c0_i32 : i32
    %1 = arith.extui %0 : i1 to i32
    %c0_i32_0 = arith.constant 0 : i32
    %2 = arith.cmpi ne, %1, %c0_i32_0 : i32
    scf.if %2 {
      %cst_16 = arith.constant 0.000000e+00 : f32
      %23 = vector.broadcast %cst_16 : f32 to vector<2x16xf32>
      %c0_17 = arith.constant 0 : index
      %c0_18 = arith.constant 0 : index
      %c0_19 = arith.constant 0 : index
      %24 = vector.load %arg4[%c0_17, %c0_18, %c0_19] : memref<1x2x16xf32, #tpu.memory_space<vmem>>, vector<1x2x16xf32>
      %25 = vector.shape_cast %24 : vector<1x2x16xf32> to vector<2x16xf32>
      %26 = vector.shape_cast %23 : vector<2x16xf32> to vector<1x2x16xf32>
      tpu.vector_store %arg4[%c0_17, %c0_18, %c0_19], %26 {strides = array<i32>} : memref<1x2x16xf32, #tpu.memory_space<vmem>>, vector<1x2x16xf32>,
    } else {
    }
    %c0 = arith.constant 0 : index
    %c0_1 = arith.constant 0 : index
    %3 = vector.load %arg2[%c0, %c0_1] : memref<128x16xf32, #tpu.memory_space<vmem>>, vector<128x16xf32>
    %c0_2 = arith.constant 0 : index
    %c0_3 = arith.constant 0 : index
    %4 = vector.load %arg3[%c0_2, %c0_3] : memref<128x16xf32, #tpu.memory_space<vmem>>, vector<128x16xf32>
    %c0_4 = arith.constant 0 : index
    %c0_5 = arith.constant 0 : index
    %c0_6 = arith.constant 0 : index
    %5 = vector.load %arg4[%c0_4, %c0_5, %c0_6] : memref<1x2x16xf32, #tpu.memory_space<vmem>>, vector<1x1x16xf32>
    %6 = vector.shape_cast %5 : vector<1x1x16xf32> to vector<1x16xf32>
    %7 = arith.addf %3, %4 : vector<128x16xf32>
    %cst = arith.constant dense<0.000000e+00> : vector<16xf32>
    %8 = vector.multi_reduction <add>, %7, %cst [0] : vector<128x16xf32> to vector<16xf32>
    %9 = vector.shape_cast %8 : vector<16xf32> to vector<1x16xf32>
    %10 = arith.addf %6, %9 : vector<1x16xf32>
    %c0_7 = arith.constant 0 : index
    %c0_8 = arith.constant 0 : index
    %c0_9 = arith.constant 0 : index
    %11 = vector.load %arg4[%c0_7, %c0_8, %c0_9] : memref<1x2x16xf32, #tpu.memory_space<vmem>>, vector<1x1x16xf32>
    %12 = vector.shape_cast %11 : vector<1x1x16xf32> to vector<1x16xf32>
    %13 = vector.shape_cast %10 : vector<1x16xf32> to vector<1x1x16xf32>
    tpu.vector_store %arg4[%c0_7, %c0_8, %c0_9], %13 {strides = array<i32>} : memref<1x2x16xf32, #tpu.memory_space<vmem>>, vector<1x1x16xf32>,
    %c0_10 = arith.constant 0 : index
    %c1 = arith.constant 1 : index
    %c0_11 = arith.constant 0 : index
    %14 = vector.load %arg4[%c0_10, %c1, %c0_11] : memref<1x2x16xf32, #tpu.memory_space<vmem>>, vector<1x1x16xf32>
    %15 = vector.shape_cast %14 : vector<1x1x16xf32> to vector<1x16xf32>
    %16 = arith.mulf %3, %4 : vector<128x16xf32>
    %cst_12 = arith.constant dense<0.000000e+00> : vector<16xf32>
    %17 = vector.multi_reduction <add>, %16, %cst_12 [0] : vector<128x16xf32> to vector<16xf32>
    %18 = vector.shape_cast %17 : vector<16xf32> to vector<1x16xf32>
    %19 = arith.addf %15, %18 : vector<1x16xf32>
    %c0_13 = arith.constant 0 : index
    %c1_14 = arith.constant 1 : index
    %c0_15 = arith.constant 0 : index
    %20 = vector.load %arg4[%c0_13, %c1_14, %c0_15] : memref<1x2x16xf32, #tpu.memory_space<vmem>>, vector<1x1x16xf32>
    %21 = vector.shape_cast %20 : vector<1x1x16xf32> to vector<1x16xf32>
    %22 = vector.shape_cast %19 : vector<1x16xf32> to vector<1x1x16xf32>
    tpu.vector_store %arg4[%c0_13, %c1_14, %c0_15], %22 {strides = array<i32>} : memref<1x2x16xf32, #tpu.memory_space<vmem>>, vector<1x1x16xf32>,
    return
  }
  func.func @transform_0(%arg0: i32, %arg1: i32) -> (i32, i32) {
    %c1_i32 = arith.constant 1 : i32
    %0 = arith.muli %arg0, %c1_i32 : i32
    %1 = arith.addi %0, %arg1 : i32
    %c0_i32 = arith.constant 0 : i32
    %2 = arith.minsi %1, %c0_i32 : i32
    %c0_i32_0 = arith.constant 0 : i32
    %c0_i32_1 = arith.constant 0 : i32
    return %2, %c0_i32_0 : i32, i32
  }
  func.func @transform_1(%arg0: i32, %arg1: i32) -> (i32, i32) {
    %c1_i32 = arith.constant 1 : i32
    %0 = arith.muli %arg0, %c1_i32 : i32
    %1 = arith.addi %0, %arg1 : i32
    %c0_i32 = arith.constant 0 : i32
    %2 = arith.minsi %1, %c0_i32 : i32
    %c0_i32_0 = arith.constant 0 : i32
    %c0_i32_1 = arith.constant 0 : i32
    return %2, %c0_i32_0 : i32, i32
  }
  func.func @transform_2(%arg0: i32, %arg1: i32) -> (i32, i32, i32) {
    %c0_i32 = arith.constant 0 : i32
    %c0_i32_0 = arith.constant 0 : i32
    %c0_i32_1 = arith.constant 0 : i32
    return %arg0, %c0_i32, %c0_i32_0 : i32, i32, i32
  }
}

</mosaic_0001>

<bundles_post_ra>
// kernel: cel_loss.1
= control target key start
LH: loop header
LB: loop body
LE: loop exit
PB: predicated region body
PF: predicated region fallthrough
CT: control target
= control target key end

     0   :  { %7 = vsyncpa [#allocation3], 0  ;;  %s343_s0 = inlined_call_operand.hbm [shape: f32[128,16], index: 0, kind: input, shape index: {}]   ;;  %s344_s1 = inlined_call_operand.hbm [shape: f32[128,16], index: 1, kind: input, shape index: {}]   ;;  %s345_s2 = inlined_call_operand.vmem [shape: f32[1,2,16], index: 2, kind: output, shape index: {}]  }
   0x1   :  { %8 = vsyncpa [#allocation5], 0  ;;  %s270_s9 = smov [#allocation2]  }
   0x2   :  { %s20_s10 = sshll.u32 %s270_s9, 4  ;;  %s21_s10 = int_to_ptr.vmem [resolvable:$true] %s20_s10 }
   0x3   :  { %s234_s11 = scalar_lea.vmem %s21_s10, 2048  ;;  %p239_p1 = scmp.lt.s32.totalorder %s21_s10, %s21_s10 }
   0x4   :  { %p235_p0 = scmp.ne.s32.totalorder %s21_s10, %s234_s11  ;;  %p240_p2 = scmp.lt.s32.totalorder %s234_s11, %s234_s11 }
   0x6   :  { %p241_p3 = por %p240_p2, %p239_p1 }
   0x8   :  { %p242_p4 = pnand %p241_p3, %p235_p0 }
   0xa   :  { %245 = shalt.err (!%p242_p4)
}
   0xb   :  { %s271_s12 = smov 128   ;;  %s272_s13 = smov 8  }
   0xc   :  { %26 = dma.hbm_to_vmem [thread:$0]  %s343_s0, 2048, %s21_s10, [#allocation3], %s271_s12, %s271_s12, %s272_s13  }
   0xd   :  { %s273_s16 = smov [#allocation4]  }
   0xe   :  { %s38_s17 = sshll.u32 %s273_s16, 4  ;;  %s39_s17 = int_to_ptr.vmem [resolvable:$true] %s38_s17 }
   0xf   :  { %s254_s18 = scalar_lea.vmem %s39_s17, 2048  ;;  %p259_p6 = scmp.lt.s32.totalorder %s39_s17, %s39_s17 }
  0x10   :  { %p255_p5 = scmp.ne.s32.totalorder %s39_s17, %s254_s18  ;;  %p260_p7 = scmp.lt.s32.totalorder %s254_s18, %s254_s18 }
  0x12   :  { %p261_p8 = por %p260_p7, %p259_p6 }
  0x14   :  { %p262_p9 = pnand %p261_p8, %p255_p5 }
  0x16   :  { %265 = shalt.err (!%p262_p9)
}
  0x17   :  { %44 = dma.hbm_to_vmem [thread:$0]  %s344_s1, 2048, %s39_s17, [#allocation5], %s271_s12, %s271_s12, %s272_s13  }
  0x18   :  { %266 = dma.done.wait [#allocation3], 2048  }
  0x19   :  { %267 = vsyncadd [#allocation3], 4294965248 }
  0x1a   :  { %268 = dma.done.wait [#allocation5], 2048  }
  0x1b   :  { %269 = vsyncadd [#allocation5], 4294965248  ;;  %vm63_vm0 = vcmask 123904   ;;  %v274_v0 = vmov 0.0   ;;  %v65_v1 = vld [vmem:[#allocation2] sm:$0xff]  ;;  %v66_v2 = vld [vmem:[#allocation2 + $0x8] sm:$0xff] }
  0x1c   :  { %64 = vst.msk [vmem:[%s345_s2] sm:$0x3] %vm63_vm0, %v274_v0  ;;  %v67_v3 = vld [vmem:[#allocation2 + $0x10] sm:$0xff]  ;;  %v68_v4 = vld [vmem:[#allocation2 + $0x18] sm:$0xff]  ;;  %v69_v5 = vld [vmem:[#allocation2 + $0x20] sm:$0xff]  ;;  %vm114_vm1 = vcmask 130048  }
  0x1d   :  { %v81_v6 = vld [vmem:[#allocation4] sm:$0xff]  ;;  %v82_v7 = vld [vmem:[#allocation4 + $0x8] sm:$0xff]  ;;  %v83_v8 = vld [vmem:[#allocation4 + $0x10] sm:$0xff]  ;;  %vm153_vm2 = vcmask 122880  }
  0x1e   :  { %v84_v9 = vld [vmem:[#allocation4 + $0x18] sm:$0xff]  ;;  %v85_v10 = vld [vmem:[#allocation4 + $0x20] sm:$0xff]  ;;  %v98_v11 = vadd.f32 %v81_v6, %v65_v1  ;;  %v99_v12 = vadd.f32 %v82_v7, %v66_v2  ;;  %v100_v13 = vadd.f32 %v83_v8, %v67_v3  ;;  %v70_v15 = vld [vmem:[#allocation2 + $0x28] sm:$0xff]  ;;  %v156_v38 = vmul.f32 %v81_v6, %v65_v1 }
  0x1f   :  { %v101_v14 = vadd.f32 %v84_v9, %v68_v4  ;;  %v86_v16 = vld [vmem:[#allocation4 + $0x28] sm:$0xff]  ;;  %v102_v18 = vadd.f32 %v85_v10, %v69_v5  ;;  %v71_v20 = vld [vmem:[#allocation2 + $0x30] sm:$0xff]  ;;  %v72_v23 = vld [vmem:[#allocation2 + $0x38] sm:$0xff]  ;;  %v157_v39 = vmul.f32 %v82_v7, %v66_v2  ;;  %v158_v40 = vmul.f32 %v83_v8, %v67_v3 }
  0x20   :  { %v115_v17 = vsel %vm114_vm1, %v98_v11, 0.0  ;;  %v116_v19 = vsel %vm114_vm1, %v99_v12, 0.0  ;;  %v87_v21 = vld [vmem:[#allocation4 + $0x30] sm:$0xff]  ;;  %v88_v24 = vld [vmem:[#allocation4 + $0x38] sm:$0xff]  ;;  %v103_v25 = vadd.f32 %v86_v16, %v70_v15  ;;  %v118_v26 = vsel %vm114_vm1, %v100_v13, 0.0  ;;  %v73_v31 = vld [vmem:[#allocation2 + $0x40] sm:$0xff] }
  0x21   :  { %v117_v22 = vadd.f32 %v116_v19, %v115_v17  ;;  %v120_v27 = vsel %vm114_vm1, %v101_v14, 0.0  ;;  %v104_v29 = vadd.f32 %v87_v21, %v71_v20  ;;  %v122_v30 = vsel %vm114_vm1, %v102_v18, 0.0  ;;  %v89_v32 = vld [vmem:[#allocation4 + $0x40] sm:$0xff]  ;;  %v74_v35 = vld [vmem:[#allocation2 + $0x48] sm:$0xff]  ;;  %v75_v45 = vld [vmem:[#allocation2 + $0x50] sm:$0xff] }
  0x22   :  { %v105_v33 = vadd.f32 %v88_v24, %v72_v23  ;;  %v90_v36 = vld [vmem:[#allocation4 + $0x48] sm:$0xff]  ;;  %v124_v37 = vsel %vm114_vm1, %v103_v25, 0.0  ;;  %v106_v42 = vadd.f32 %v89_v32, %v73_v31  ;;  %v159_v44 = vmul.f32 %v84_v9, %v68_v4  ;;  %v91_v46 = vld [vmem:[#allocation4 + $0x50] sm:$0xff]  ;;  %v76_v54 = vld [vmem:[#allocation2 + $0x58] sm:$0xff] }
  0x23   :  { %v119_v28 = vadd.f32 %v118_v26, %v117_v22  ;;  %v126_v43 = vsel %vm114_vm1, %v104_v29, 0.0  ;;  %v107_v47 = vadd.f32 %v90_v36, %v74_v35  ;;  %v160_v50 = vmul.f32 %v85_v10, %v69_v5  ;;  %v92_v55 = vld [vmem:[#allocation4 + $0x58] sm:$0xff]  ;;  %v77_v62 = vld [vmem:[#allocation2 + $0x60] sm:$0xff]  ;;  %v78_v6 = vld [vmem:[#allocation2 + $0x68] sm:$0xff] }
  0x24   :  { %v128_v49 = vsel %vm114_vm1, %v105_v33, 0.0  ;;  %v172_v51 = vsel %vm114_vm1, %v156_v38, 0.0  ;;  %v173_v52 = vsel %vm114_vm1, %v157_v39, 0.0  ;;  %v175_v53 = vsel %vm114_vm1, %v158_v40, 0.0  ;;  %v93_v63 = vld [vmem:[#allocation4 + $0x60] sm:$0xff]  ;;  %v94_v7 = vld [vmem:[#allocation4 + $0x68] sm:$0xff] }
  0x25   :  { %v121_v34 = vadd.f32 %v120_v27, %v119_v28  ;;  %v174_v57 = vadd.f32 %v173_v52, %v172_v51  ;;  %v108_v58 = vadd.f32 %v91_v46, %v75_v45  ;;  %v130_v59 = vsel %vm114_vm1, %v106_v42, 0.0  ;;  %v79_v14 = vld [vmem:[#allocation2 + $0x70] sm:$0xff]  ;;  %v80_v22 = vld [vmem:[#allocation2 + $0x78] sm:$0xff] }
  0x26   :  { %v161_v60 = vmul.f32 %v86_v16, %v70_v15  ;;  %v177_v61 = vsel %vm114_vm1, %v159_v44, 0.0  ;;  %v109_v2 = vadd.f32 %v92_v55, %v76_v54  ;;  %v132_v3 = vsel %vm114_vm1, %v107_v47, 0.0  ;;  %v95_v15 = vld [vmem:[#allocation4 + $0x70] sm:$0xff]  ;;  %v96_v25 = vld [vmem:[#allocation4 + $0x78] sm:$0xff] }
  0x27   :  { %v123_v41 = vadd.f32 %v122_v30, %v121_v34  ;;  %v176_v1 = vadd.f32 %v175_v53, %v174_v57  ;;  %v162_v4 = vmul.f32 %v87_v21, %v71_v20  ;;  %v179_v5 = vsel %vm114_vm1, %v160_v50, 0.0 }
  0x28   :  { %v110_v10 = vadd.f32 %v93_v63, %v77_v62  ;;  %v134_v11 = vsel %vm114_vm1, %v108_v58, 0.0  ;;  %v163_v12 = vmul.f32 %v88_v24, %v72_v23  ;;  %v181_v13 = vsel %vm114_vm1, %v161_v60, 0.0 }
  0x29   :  { %v125_v48 = vadd.f32 %v124_v37, %v123_v41  ;;  %v178_v9 = vadd.f32 %v177_v61, %v176_v1  ;;  %v111_v18 = vadd.f32 %v94_v7, %v78_v6  ;;  %v136_v19 = vsel %vm114_vm1, %v109_v2, 0.0 }
  0x2a   :  { %v164_v20 = vmul.f32 %v89_v32, %v73_v31  ;;  %v183_v21 = vsel %vm114_vm1, %v162_v4, 0.0  ;;  %v112_v28 = vadd.f32 %v95_v15, %v79_v14  ;;  %v138_v29 = vsel %vm114_vm1, %v110_v10, 0.0  ;;  %v97_v4 = vld [vmem:[%s345_s2] sm:$0x1] }
  0x2b   :  { %v127_v56 = vadd.f32 %v126_v43, %v125_v48  ;;  %v180_v17 = vadd.f32 %v179_v5, %v178_v9  ;;  %v165_v23 = vmul.f32 %v90_v36, %v74_v35  ;;  %v185_v24 = vsel %vm114_vm1, %v163_v12, 0.0  ;;  %v155_v12 = vld [vmem:[%s345_s2 + $0x1] sm:$0x1] }
  0x2c   :  { %v113_v34 = vadd.f32 %v96_v25, %v80_v22  ;;  %v140_v37 = vsel %vm114_vm1, %v111_v18, 0.0  ;;  %v166_v38 = vmul.f32 %v91_v46, %v75_v45  ;;  %v187_v31 = vsel %vm114_vm1, %v164_v20, 0.0 }
  0x2d   :  { %v129_v0 = vadd.f32 %v128_v49, %v127_v56  ;;  %v182_v27 = vadd.f32 %v181_v13, %v180_v17  ;;  %v142_v40 = vsel %vm114_vm1, %v112_v28, 0.0  ;;  %v167_v41 = vmul.f32 %v92_v55, %v76_v54 }
  0x2e   :  { %v189_v42 = vsel %vm114_vm1, %v165_v23, 0.0  ;;  %v144_v35 = vsel %vm114_vm1, %v113_v34, 0.0  ;;  %v168_v36 = vmul.f32 %v93_v63, %v77_v62  ;;  %v191_v47 = vsel %vm114_vm1, %v166_v38, 0.0 }
  0x2f   :  { %v131_v8 = vadd.f32 %v130_v59, %v129_v0  ;;  %v184_v33 = vadd.f32 %v183_v21, %v182_v27  ;;  %v169_v50 = vmul.f32 %v94_v7, %v78_v6  ;;  %v193_v45 = vsel %vm114_vm1, %v167_v41, 0.0 }
  0x30   :  { %v170_v52 = vmul.f32 %v95_v15, %v79_v14  ;;  %v195_v53 = vsel %vm114_vm1, %v168_v36, 0.0  ;;  %v171_v56 = vmul.f32 %v96_v25, %v80_v22 }
  0x31   :  { %v133_v16 = vadd.f32 %v132_v3, %v131_v8  ;;  %v186_v39 = vadd.f32 %v185_v24, %v184_v33  ;;  %v197_v57 = vsel %vm114_vm1, %v169_v50, 0.0 }
  0x32   :  { %v199_v60 = vsel %vm114_vm1, %v170_v52, 0.0  ;;  %v201_v63 = vsel %vm114_vm1, %v171_v56, 0.0 }
  0x33   :  { %v135_v26 = vadd.f32 %v134_v11, %v133_v16  ;;  %v188_v44 = vadd.f32 %v187_v31, %v186_v39 }
  0x35   :  { %v137_v30 = vadd.f32 %v136_v19, %v135_v26  ;;  %v190_v49 = vadd.f32 %v189_v42, %v188_v44 }
  0x37   :  { %v139_v32 = vadd.f32 %v138_v29, %v137_v30  ;;  %v192_v51 = vadd.f32 %v191_v47, %v190_v49 }
  0x39   :  { %v141_v43 = vadd.f32 %v140_v37, %v139_v32  ;;  %v194_v55 = vadd.f32 %v193_v45, %v192_v51 }
  0x3b   :  { %v143_v48 = vadd.f32 %v142_v40, %v141_v43  ;;  %v196_v59 = vadd.f32 %v195_v53, %v194_v55 }
  0x3d   :  { %v145_v46 = vadd.f32 %v144_v35, %v143_v48  ;;  %v198_v62 = vadd.f32 %v197_v57, %v196_v59 }
  0x3f   :  { %v146_v54 = vrot.slane %v145_v46, 4  ;;  %v200_v1 = vadd.f32 %v199_v60, %v198_v62 }
  0x41   :  { %v147_v58 = vadd.f32 %v146_v54, %v145_v46  ;;  %v202_v3 = vadd.f32 %v201_v63, %v200_v1 }
  0x43   :  { %v148_v61 = vrot.slane %v147_v58, 2  ;;  %v203_v6 = vrot.slane %v202_v3, 4 }
  0x45   :  { %v149_v0 = vadd.f32 %v148_v61, %v147_v58  ;;  %v204_v8 = vadd.f32 %v203_v6, %v202_v3 }
  0x47   :  { %v150_v2 = vrot.slane %v149_v0, 1  ;;  %v205_v9 = vrot.slane %v204_v8, 2 }
  0x49   :  { %v151_v5 = vadd.f32 %v150_v2, %v149_v0  ;;  %v206_v10 = vadd.f32 %v205_v9, %v204_v8 }
  0x4b   :  { %v152_v7 = vadd.f32 %v151_v5, %v97_v4  ;;  %v207_v11 = vrot.slane %v206_v10, 1 }
  0x4d   :  { %154 = vst.msk [vmem:[%s345_s2] sm:$0x1] %vm153_vm2, %v152_v7  ;;  %v208_v13 = vadd.f32 %v207_v11, %v206_v10 }
  0x4f   :  { %v209_v14 = vadd.f32 %v208_v13, %v155_v12 }
  0x51   :  { %210 = vst.msk [vmem:[%s345_s2 + $0x1] sm:$0x1] %vm153_vm2, %v209_v14 }
  0x52   :  { %215 = vsyncpa [#allocation3], 1 }
  0x53   :  { %216 = vsyncpa [#allocation5], 1 }

</bundles_post_ra>
